<compile_context>
chip_gen: v7x
topology: tpu7x:2x2x1
jax: 0.10.0
libtpu: 0.0.40
codegen_flags: <defaults>
</compile_context>

<pallas_src>
import functools

import jax
import jax.numpy as jnp
from jax.experimental import pallas as pl
from jax.experimental.pallas import tpu as pltpu


def _round_up(x, m):
    return (x + m - 1) // m * m


def _linear_kernel_f32_out(x_ref, w_ref, b_ref, o_ref):
    # f32 output: output block is resident across the K grid axis (index_map
    # ignores k), so accumulate directly into it -- no scratch buffer.
    k = pl.program_id(2)

    @pl.when(k == 0)
    def _():
        o_ref[...] = jnp.zeros_like(o_ref)

    o_ref[...] += jnp.dot(
        x_ref[...], w_ref[...], preferred_element_type=jnp.float32
    )

    @pl.when(k == pl.num_programs(2) - 1)
    def _():
        o_ref[...] += b_ref[...]


def _linear_kernel_acc(x_ref, w_ref, b_ref, o_ref, acc_ref):
    # Narrow output dtypes (e.g. bf16): f32 VMEM accumulator, cast once in the
    # last-K epilogue together with the bias add.
    k = pl.program_id(2)

    @pl.when(k == 0)
    def _():
        acc_ref[...] = jnp.zeros_like(acc_ref)

    acc_ref[...] += jnp.dot(
        x_ref[...], w_ref[...], preferred_element_type=jnp.float32
    )

    @pl.when(k == pl.num_programs(2) - 1)
    def _():
        o_ref[...] = (acc_ref[...] + b_ref[...]).astype(o_ref.dtype)


@functools.partial(
    jax.jit,
    static_argnames=(
        "connection_possibility_status",
        "compute_dtype",
        "tm_cap",
        "tn_cap",
        "tk_cap",
    ),
)
def linear_forward(
    x,
    w_t,
    b,
    *,
    connection_possibility_status,
    compute_dtype=None,
    tm_cap=512,     # multiple of 32 (covers f32/bf16/int8 sublane packing)
    tn_cap=1024,    # multiple of 256 (dense MXU pushes, lane-dense stores)
    tk_cap=1024,    # multiple of 256
):
    """Forward of the `Linear` module.

    x   : (..., hidden_enc)
    w_t : (hidden_enc, hidden_dec)   (PyTorch weight transposed)
    b   : (hidden_dec,)
    compute_dtype : optional MXU operand dtype (e.g. jnp.bfloat16).  For best
        performance store w_t/b in that dtype at init (no per-call cast).
    """
    if connection_possibility_status:
        # num_directions * hidden_size_encoder == hidden_size_decoder
        return x

    orig_shape = x.shape
    out_dtype = x.dtype
    K = orig_shape[-1]
    N = w_t.shape[1]
    x2d = x.reshape(-1, K)
    M = x2d.shape[0]

    if compute_dtype is not None:
        if x2d.dtype != compute_dtype:
            x2d = x2d.astype(compute_dtype)
        if w_t.dtype != compute_dtype:
            # Prefer pre-casting W at init; this path costs an extra HBM pass.
            w_t = w_t.astype(compute_dtype)
    b2d = b.reshape(1, N).astype(jnp.float32)

    # ----- tile selection ---------------------------------------------------
    # Blocks equal to the full array dim are exempt from the (8,128) rule, so
    # small dims never need padding.  Ragged trailing M/N blocks are safe:
    # garbage they read only reaches output rows/cols masked on writeback.
    tm = M if M <= tm_cap else tm_cap
    tn = N if N <= tn_cap else tn_cap

    if K <= tk_cap:
        tk, Kp = K, K
    else:
        # The reduction axis must be exactly covered: zero-pad K to a multiple
        # of 128 and pick the largest 128-multiple tile <= cap dividing it.
        Kp = _round_up(K, 128)
        tk = 128
        for cand in range((tk_cap // 128) * 128, 127, -128):
            if Kp % cand == 0:
                tk = cand
                break
        if Kp != K:
            x2d = jnp.pad(x2d, ((0, 0), (0, Kp - K)))
            w_t = jnp.pad(w_t, ((0, Kp - K), (0, 0)))

    # Skinny-M (decode-style) case: if both parallel axes collapse to a single
    # block, split N so both v7x TensorCores get work (harmless on 1-TC chips).
    if pl.cdiv(M, tm) == 1 and pl.cdiv(N, tn) == 1 and N >= 256:
        tn = _round_up(pl.cdiv(N, 2), 128)

    grid = (pl.cdiv(M, tm), pl.cdiv(N, tn), pl.cdiv(Kp, tk))

    x_item = jnp.dtype(x2d.dtype).itemsize
    w_item = jnp.dtype(w_t.dtype).itemsize
    out_item = jnp.dtype(out_dtype).itemsize
    cost = pl.CostEstimate(
        flops=2 * M * N * Kp,
        transcendentals=0,
        bytes_accessed=M * Kp * x_item + Kp * N * w_item + M * N * out_item + N * 4,
    )

    if out_dtype == jnp.float32:
        kernel = _linear_kernel_f32_out
        scratch_shapes = []
    else:
        kernel = _linear_kernel_acc
        scratch_shapes = [pltpu.VMEM((tm, tn), jnp.float32)]

    out = pl.pallas_call(
        kernel,
        out_shape=jax.ShapeDtypeStruct((M, N), out_dtype),
        grid=grid,
        in_specs=[
            pl.BlockSpec((tm, tk), lambda i, j, k: (i, k)),
            pl.BlockSpec((tk, tn), lambda i, j, k: (k, j)),
            pl.BlockSpec((1, tn), lambda i, j, k: (0, j)),
        ],
        out_specs=pl.BlockSpec((tm, tn), lambda i, j, k: (i, j)),
        scratch_shapes=scratch_shapes,
        compiler_params=pltpu.CompilerParams(
            dimension_semantics=("parallel", "parallel", "arbitrary"),
            # Max-cap tiles (f32 512x1024x1024) need ~18 MiB resident
            # double-buffered; 48 MiB leaves headroom for compiler scratch and
            # stays under v7x's 64 MiB physical VMEM while raising the
            # v5e/v6e 16/32 MiB default scoped limits.
            vmem_limit_bytes=48 * 1024 * 1024,
        ),
        cost_estimate=cost,
    )(x2d, w_t, b2d)

    return out.reshape(*orig_shape[:-1], N)


def init_linear_params(key, hidden_size_encoder, hidden_size_decoder,
                       dtype=jnp.float32):
    """Deterministic synthetic parameters mimicking nn.Linear(enc, dec).

    Pass dtype=jnp.bfloat16 to store the weight in bf16 once at init (avoids a
    per-call HBM cast pass when using the bf16 compute path).
    """
    num_directions = 1
    in_features = num_directions * hidden_size_encoder
    out_features = hidden_size_decoder
    k_w, k_b = jax.random.split(key)
    bound = 1.0 / float(in_features) ** 0.5
    # PyTorch weight is (out, in); we store it transposed as (in, out).
    w_t = jax.random.uniform(
        k_w, (in_features, out_features), jnp.float32, -bound, bound
    )
    b = jax.random.uniform(k_b, (out_features,), jnp.float32, -bound, bound)
    return w_t.astype(dtype), b.astype(dtype)


if __name__ == "__main__":
    key = jax.random.PRNGKey(0)
    k_x, k_p, k_x2, k_p2, k_x3, k_p3, k_x4, k_p4 = jax.random.split(key, 8)

    # --- test 1: projection path (enc != dec), tiny shapes -------------------
    batch, seq = 2, 8
    enc, dec = 32, 64
    num_directions = 1
    status = num_directions * enc == dec
    x = jax.random.normal(k_x, (batch, seq, enc), jnp.float32)
    w_t, b = init_linear_params(k_p, enc, dec)
    y = jax.block_until_ready(
        linear_forward(x, w_t, b, connection_possibility_status=status)
    )
    y_ref = (x.reshape(-1, enc) @ w_t + b).reshape(batch, seq, dec)
    assert y.shape == (batch, seq, dec)
    assert jnp.allclose(y, y_ref, atol=1e-5, rtol=1e-5)

    # --- test 2: non-128-aligned dims, pad-free full-dim-block path ----------
    enc2, dec2 = 48, 80
    x2 = jax.random.normal(k_x2, (3, 5, enc2), jnp.float32)
    w_t2, b2 = init_linear_params(k_p2, enc2, dec2)
    y2 = jax.block_until_ready(
        linear_forward(x2, w_t2, b2, connection_possibility_status=False)
    )
    y2_ref = (x2.reshape(-1, enc2) @ w_t2 + b2).reshape(3, 5, dec2)
    assert jnp.allclose(y2, y2_ref, atol=1e-5, rtol=1e-5)

    # --- test 3: multi-block grid with ragged M/N edges and K accumulation ---
    enc3, dec3 = 256, 200
    x3 = jax.random.normal(k_x3, (3, 10, enc3), jnp.float32)   # M = 30
    w_t3, b3 = init_linear_params(k_p3, enc3, dec3)
    y3 = jax.block_until_ready(
        linear_forward(x3, w_t3, b3, connection_possibility_status=False,
                       tm_cap=16, tn_cap=128, tk_cap=128)
    )
    y3_ref = (x3.reshape(-1, enc3) @ w_t3 + b3).reshape(3, 10, dec3)
    assert jnp.allclose(y3, y3_ref, atol=1e-4, rtol=1e-4)

    # --- test 4: bf16 compute/output path (params stored in bf16 at init) ----
    enc4, dec4 = 256, 320
    x4 = jax.random.normal(k_x4, (4, 16, enc4), jnp.bfloat16)
    w_t4, b4 = init_linear_params(k_p4, enc4, dec4, dtype=jnp.bfloat16)
    y4 = jax.block_until_ready(
        linear_forward(x4, w_t4, b4, connection_possibility_status=False,
                       compute_dtype=jnp.bfloat16)
    )
    y4_ref = (
        x4.astype(jnp.float32).reshape(-1, enc4) @ w_t4.astype(jnp.float32)
        + b4.astype(jnp.float32)
    ).reshape(4, 16, dec4)
    assert y4.dtype == jnp.bfloat16
    assert jnp.allclose(y4.astype(jnp.float32), y4_ref, atol=2e-2, rtol=2e-2)

    # --- test 5: identity branch (encoder == decoder) -------------------------
    w_t5, b5 = init_linear_params(k_p, enc, enc)
    y5 = jax.block_until_ready(
        linear_forward(x, w_t5, b5, connection_possibility_status=True)
    )
    assert jnp.array_equal(y5, x)

    print("KERNEL_OK")
</pallas_src>

<mosaic_0001>
module attributes {stable_mosaic.version = 11 : i64} {
  func.func @_linear_kernel_f32_out(%arg0: i32, %arg1: i32, %arg2: i32, %arg3: memref<16x32xf32, #tpu.memory_space<vmem>>, %arg4: memref<32x64xf32, #tpu.memory_space<vmem>>, %arg5: memref<1x64xf32, #tpu.memory_space<vmem>>, %arg6: memref<16x64xf32, #tpu.memory_space<vmem>>) attributes {dimension_semantics = [#tpu.dimension_semantics<parallel>, #tpu.dimension_semantics<parallel>, #tpu.dimension_semantics<arbitrary>], iteration_bounds = array<i64: 1, 1, 1>, scalar_prefetch = 0 : i64, scratch_operands = 0 : i64, tpu.core_type = #tpu.core_type<tc>, window_params = [{transform_indices = @transform_0, window_bounds = array<i64: 16, 32>}, {transform_indices = @transform_1, window_bounds = array<i64: 32, 64>}, {transform_indices = @transform_2, window_bounds = array<i64: 1, 64>}, {transform_indices = @transform_3, window_bounds = array<i64: 16, 64>}]} {
    %c0_i32 = arith.constant 0 : i32
    %0 = arith.cmpi eq, %arg2, %c0_i32 : i32
    %1 = arith.extui %0 : i1 to i32
    %c0_i32_0 = arith.constant 0 : i32
    %2 = arith.cmpi ne, %1, %c0_i32_0 : i32
    scf.if %2 {
      %cst_10 = arith.constant 0.000000e+00 : f32
      %12 = vector.broadcast %cst_10 : f32 to vector<16x64xf32>
      %c0_11 = arith.constant 0 : index
      %c0_12 = arith.constant 0 : index
      %13 = vector.load %arg6[%c0_11, %c0_12] : memref<16x64xf32, #tpu.memory_space<vmem>>, vector<16x64xf32>
      tpu.vector_store %arg6[%c0_11, %c0_12], %12 {strides = array<i32>} : memref<16x64xf32, #tpu.memory_space<vmem>>, vector<16x64xf32>,
    } else {
    }
    %c0 = arith.constant 0 : index
    %c0_1 = arith.constant 0 : index
    %3 = vector.load %arg6[%c0, %c0_1] : memref<16x64xf32, #tpu.memory_space<vmem>>, vector<16x64xf32>
    %c0_2 = arith.constant 0 : index
    %c0_3 = arith.constant 0 : index
    %4 = vector.load %arg3[%c0_2, %c0_3] : memref<16x32xf32, #tpu.memory_space<vmem>>, vector<16x32xf32>
    %c0_4 = arith.constant 0 : index
    %c0_5 = arith.constant 0 : index
    %5 = vector.load %arg4[%c0_4, %c0_5] : memref<32x64xf32, #tpu.memory_space<vmem>>, vector<32x64xf32>
    %cst = arith.constant dense<0.000000e+00> : vector<16x64xf32>
    %6 = tpu.matmul %4, %5, %cst {dimension_numbers = #tpu.dot_dimension_numbers<[1], [0], [0], [1], [0, 0, 1, 1], [], []>} : vector<16x32xf32>, vector<32x64xf32>, vector<16x64xf32> -> vector<16x64xf32>
    %7 = arith.addf %3, %6 : vector<16x64xf32>
    %c0_6 = arith.constant 0 : index
    %c0_7 = arith.constant 0 : index
    %8 = vector.load %arg6[%c0_6, %c0_7] : memref<16x64xf32, #tpu.memory_space<vmem>>, vector<16x64xf32>
    tpu.vector_store %arg6[%c0_6, %c0_7], %7 {strides = array<i32>} : memref<16x64xf32, #tpu.memory_space<vmem>>, vector<16x64xf32>,
    %c0_i32_8 = arith.constant 0 : i32
    %9 = arith.cmpi eq, %arg2, %c0_i32_8 : i32
    %10 = arith.extui %9 : i1 to i32
    %c0_i32_9 = arith.constant 0 : i32
    %11 = arith.cmpi ne, %10, %c0_i32_9 : i32
    scf.if %11 {
      %c0_10 = arith.constant 0 : index
      %c0_11 = arith.constant 0 : index
      %12 = vector.load %arg6[%c0_10, %c0_11] : memref<16x64xf32, #tpu.memory_space<vmem>>, vector<16x64xf32>
      %c0_12 = arith.constant 0 : index
      %c0_13 = arith.constant 0 : index
      %13 = vector.load %arg5[%c0_12, %c0_13] : memref<1x64xf32, #tpu.memory_space<vmem>>, vector<1x64xf32>
      %14 = vector.broadcast %13 : vector<1x64xf32> to vector<16x64xf32>
      %15 = arith.addf %12, %14 : vector<16x64xf32>
      %c0_14 = arith.constant 0 : index
      %c0_15 = arith.constant 0 : index
      %16 = vector.load %arg6[%c0_14, %c0_15] : memref<16x64xf32, #tpu.memory_space<vmem>>, vector<16x64xf32>
      tpu.vector_store %arg6[%c0_14, %c0_15], %15 {strides = array<i32>} : memref<16x64xf32, #tpu.memory_space<vmem>>, vector<16x64xf32>,
    } else {
    }
    return
  }
  func.func @transform_0(%arg0: i32, %arg1: i32, %arg2: i32) -> (i32, i32) {
    %c0_i32 = arith.constant 0 : i32
    return %arg0, %arg2 : i32, i32
  }
  func.func @transform_1(%arg0: i32, %arg1: i32, %arg2: i32) -> (i32, i32) {
    %c0_i32 = arith.constant 0 : i32
    return %arg2, %arg1 : i32, i32
  }
  func.func @transform_2(%arg0: i32, %arg1: i32, %arg2: i32) -> (i32, i32) {
    %c0_i32 = arith.constant 0 : i32
    %c0_i32_0 = arith.constant 0 : i32
    return %c0_i32, %arg1 : i32, i32
  }
  func.func @transform_3(%arg0: i32, %arg1: i32, %arg2: i32) -> (i32, i32) {
    %c0_i32 = arith.constant 0 : i32
    return %arg0, %arg1 : i32, i32
  }
}

</mosaic_0001>

<bundles_post_ra>
// kernel: linear_forward.1
= control target key start
LH: loop header
LB: loop body
LE: loop exit
PB: predicated region body
PF: predicated region fallthrough
CT: control target
= control target key end

     0   :  { %8 = vsyncpa [#allocation3], 0  ;;  %s365_s0 = inlined_call_operand.hbm [shape: f32[16,32], index: 0, kind: input, shape index: {}]   ;;  %s366_s1 = inlined_call_operand.hbm [shape: f32[32,64], index: 1, kind: input, shape index: {}]   ;;  %s367_s2 = inlined_call_operand.vmem [shape: f32[1,64], index: 2, kind: input, shape index: {}]   ;;  %s368_s3 = inlined_call_operand.hbm [shape: f32[16,64], index: 3, kind: output, shape index: {}]  }
   0x1   :  { %9 = vsyncpa [#allocation6], 0 }
   0x2   :  { %10 = vsyncpa [#allocation4], 0  ;;  %s285_s12 = smov [#allocation2]   ;;  %s213_s16 = scalar_lea.hbm %s365_s0, 256 }
   0x3   :  { %s16_s13 = sshll.u32 %s285_s12, 4  ;;  %p214_p0 = scmp.ne.s32.totalorder %s365_s0, %s213_s16  ;;  %s17_s13 = int_to_ptr.vmem [resolvable:$true] %s16_s13 }
   0x4   :  { %p217_p1 = scmp.lt.u32.totalorder %s213_s16, %s365_s0 }
   0x6   :  { %p219_p2 = pnand %p217_p1, %p214_p0 }
   0x8   :  { %222 = shalt.err (!%p219_p2)
}
   0x9   :  { %s223_s21 = scalar_lea.vmem %s17_s13, 256  ;;  %p228_p4 = scmp.lt.s32.totalorder %s17_s13, %s17_s13 }
   0xa   :  { %p224_p3 = scmp.ne.s32.totalorder %s17_s13, %s223_s21  ;;  %p229_p5 = scmp.lt.s32.totalorder %s223_s21, %s223_s21 }
   0xc   :  { %p230_p6 = por %p229_p5, %p228_p4 }
   0xe   :  { %p231_p7 = pnand %p230_p6, %p224_p3 }
  0x10   :  { %234 = shalt.err (!%p231_p7)
}
  0x11   :  { %s286_s22 = smov 128   ;;  %s287_s23 = smov 8  }
  0x12   :  { %22 = dma.hbm_to_vmem [thread:$0]  %s365_s0, 256, %s17_s13, [#allocation3], %s286_s22, %s286_s22, %s287_s23  }
  0x13   :  { %s288_s26 = smov [#allocation5]   ;;  %s235_s30 = scalar_lea.hbm %s366_s1, 512 }
  0x14   :  { %s28_s27 = sshll.u32 %s288_s26, 4  ;;  %p236_p8 = scmp.ne.s32.totalorder %s366_s1, %s235_s30  ;;  %s29_s27 = int_to_ptr.vmem [resolvable:$true] %s28_s27 }
  0x15   :  { %p239_p9 = scmp.lt.u32.totalorder %s235_s30, %s366_s1 }
  0x17   :  { %p241_p10 = pnand %p239_p9, %p236_p8 }
  0x19   :  { %244 = shalt.err (!%p241_p10)
}
  0x1a   :  { %s245_s8 = scalar_lea.vmem %s29_s27, 512  ;;  %p250_p12 = scmp.lt.s32.totalorder %s29_s27, %s29_s27 }
  0x1b   :  { %p246_p11 = scmp.ne.s32.totalorder %s29_s27, %s245_s8  ;;  %p251_p13 = scmp.lt.s32.totalorder %s245_s8, %s245_s8 }
  0x1d   :  { %p252_p0 = por %p251_p13, %p250_p12 }
  0x1f   :  { %p253_p1 = pnand %p252_p0, %p246_p11 }
  0x21   :  { %256 = shalt.err (!%p253_p1)
}
  0x22   :  { %34 = dma.hbm_to_vmem [thread:$0]  %s366_s1, 512, %s29_s27, [#allocation6], %s286_s22, %s286_s22, %s287_s23  }
  0x23   :  { %279 = dma.done.wait [#allocation3], 256  }
  0x24   :  { %280 = vsyncadd [#allocation3], 4294967040 }
  0x25   :  { %281 = dma.done.wait [#allocation6], 512  }
  0x26   :  { %282 = vsyncadd [#allocation6], 4294966784  ;;  %vm47_vm0 = vcmask 523264   ;;  %v289_v0 = vmov 0.0   ;;  %vm58_vm1 = vcmask 261120   ;;  %v54_v1 = vld [vmem:[#allocation5] sm:$0xff] }
  0x27   :  { %49 = vst.msk [vmem:[#allocation7 + $0x8] sm:$0xff] %vm47_vm0, %v289_v0  ;;  %48 = vst.msk [vmem:[#allocation7] sm:$0xff] %vm47_vm0, %v289_v0  ;;  %v55_v2 = vld [vmem:[#allocation5 + $0x8] sm:$0xff]  ;;  %v56_v3 = vld [vmem:[#allocation5 + $0x10] sm:$0xff]  ;;  %s290_s11 = smov [#allocation7]  }
  0x28   :  { %v199_v4 = vpack.c.bf16 %v55_v2, %v54_v1  ;;  %v57_v5 = vld [vmem:[#allocation5 + $0x18] sm:$0xff]  ;;  %v52_v6 = vld [vmem:[#allocation2] sm:$0xff]  ;;  %s166_s12 = sshll.u32 %s290_s11, 4  ;;  %s167_s12 = int_to_ptr.vmem [resolvable:$true] %s166_s12 }
  0x29   :  { %v203_v7 = vpack.c.bf16 %v57_v5, %v56_v3  ;;  %196 = vmatprep.mubr.msk.f32.mxu0 %vm58_vm1, %v52_v6  ;;  %v53_v8 = vld [vmem:[#allocation2 + $0x8] sm:$0xff]  ;;  %v181_v15 = vld [vmem:[%s367_s2] ss:$0 sm:$0xff]  ;;  %s257_s13 = scalar_lea.vmem %s167_s12, 256  ;;  %p262_p3 = scmp.lt.s32.totalorder %s167_s12, %s167_s12 }
  0x2a   :  { %200 = vmatprep.subr.bf16.mxu0 %v199_v4  ;;  %p258_p2 = scmp.ne.s32.totalorder %s167_s12, %s257_s13  ;;  %p263_p4 = scmp.lt.s32.totalorder %s257_s13, %s257_s13 }
  0x2b   :  { %202 = vmatpush3.bf16.msra.mxu0 %v199_v4 }
  0x2c   :  { %204 = vmatprep.subr.bf16.mxu0 %v203_v7  ;;  %p264_p5 = por %p263_p4, %p262_p3 }
  0x2e   :  { %v51_v9 = vld [vmem:[#allocation7 + $0x8] sm:$0xff]  ;;  %v50_v10 = vld [vmem:[#allocation7] sm:$0xff]  ;;  %p265_p6 = pnand %p264_p5, %p258_p2 }
  0x2f   :  { %206 = vmatpush3.bf16.msra.mxu0 %v203_v7 }
  0x32   :  { %197 = vmatmul.mubr.msk.f32.vlgmr.msra.gmra.mrb[0].mxu0 %vm58_vm1, %v53_v8 }
 0x105   :  { %v198_v11 = vpop.f32.mrb[0].mxu0 }
 0x106   :  { %v141_v12 = vadd.f32 %v198_v11, %v51_v9  ;;  %v131_v13 = vpop.f32.mrb[1].mxu0 }
 0x107   :  { %v140_v14 = vadd.f32 %v131_v13, %v50_v10 }
 0x108   :  { %144 = vst.msk [vmem:[#allocation7 + $0x8] sm:$0xff] %vm47_vm0, %v141_v12 }
 0x109   :  { %143 = vst.msk [vmem:[#allocation7] sm:$0xff] %vm47_vm0, %v140_v14 }
 0x10f   :  { %v149_v16 = vld [vmem:[#allocation7 + $0x8] sm:$0xff] }
 0x110   :  { %v148_v17 = vld [vmem:[#allocation7] sm:$0xff]  ;;  %v158_v18 = vadd.f32 %v181_v15, %v149_v16 }
 0x111   :  { %v157_v19 = vadd.f32 %v181_v15, %v148_v17 }
 0x112   :  { %160 = vst.msk [vmem:[#allocation7 + $0x8] sm:$0xff] %vm47_vm0, %v158_v18 }
 0x113   :  { %159 = vst.msk [vmem:[#allocation7] sm:$0xff] %vm47_vm0, %v157_v19 }
 0x114   :  { %268 = shalt.err (!%p265_p6)
}
 0x115   :  { %s269_s15 = scalar_lea.hbm %s368_s3, 256 }
 0x116   :  { %p270_p7 = scmp.ne.s32.totalorder %s368_s3, %s269_s15  ;;  %p273_p8 = scmp.lt.u32.totalorder %s269_s15, %s368_s3 }
 0x118   :  { %p275_p9 = pnand %p273_p8, %p270_p7 }
 0x11a   :  { %278 = shalt.err (!%p275_p9)
}
 0x11b   :  { %172 = dma.vmem_to_hbm [thread:$0]  %s167_s12, 256, %s368_s3, [#allocation4], %s286_s22, %s286_s22, %s287_s23  }
 0x11c   :  { %283 = dma.done.wait [#allocation4], 256  }
 0x11d   :  { %284 = vsyncadd [#allocation4], 4294967040 }
 0x11e   :  { %176 = vsyncpa [#allocation3], 1 }
 0x11f   :  { %177 = vsyncpa [#allocation6], 1 }
 0x120   :  { %178 = vsyncpa [#allocation4], 1 }

</bundles_post_ra>
